<compile_context>
chip_gen: v5e
topology: v5e:2x2
jax: 0.10.0
libtpu: 0.0.40
codegen_flags: <defaults>
</compile_context>

<pallas_src>
import math
from functools import partial

import jax
import jax.numpy as jnp
from jax.experimental import pallas as pl
from jax.experimental.pallas import tpu as pltpu

CARDINALITY = 8   # scaled-down cardinality (real net uses 32)
TM_MAX = 256      # row tile (M axis, parallel)
TK_MAX = 512      # reduction tile (K axis, arbitrary)
FC_PAD = 128      # pad FC output columns to a full lane width


def _round_up(x, m):
    return ((x + m - 1) // m) * m


def _pad2d(x, rows, cols):
    r, c = x.shape
    if r == rows and c == cols:
        return x
    return jnp.pad(x, ((0, rows - r), (0, cols - c)))


# ------------------------------------------------------------------
# Fused tiled matmul: y = act((A @ W) * scale + shift [+ residual])
# ------------------------------------------------------------------

def _make_fused_kernel(relu, sigmoid, has_residual):
    def body(a_ref, w_ref, s_ref, b_ref, r_ref, o_ref, acc_ref):
        k = pl.program_id(1)

        @pl.when(k == 0)
        def _init():
            acc_ref[...] = jnp.zeros_like(acc_ref)

        acc_ref[...] += jnp.dot(a_ref[...], w_ref[...],
                                preferred_element_type=jnp.float32)

        @pl.when(k == pl.num_programs(1) - 1)
        def _finalize():
            y = acc_ref[...] * s_ref[...] + b_ref[...]          # fused BN / bias (f32)
            if r_ref is not None:
                y = y + r_ref[...].astype(jnp.float32)          # fused residual add
            if relu:
                y = jnp.maximum(y, 0.0)
            if sigmoid:
                y = jax.nn.sigmoid(y)
            o_ref[...] = y.astype(o_ref.dtype)

    if has_residual:
        def kernel(a_ref, w_ref, s_ref, b_ref, r_ref, o_ref, acc_ref):
            body(a_ref, w_ref, s_ref, b_ref, r_ref, o_ref, acc_ref)
    else:
        def kernel(a_ref, w_ref, s_ref, b_ref, o_ref, acc_ref):
            body(a_ref, w_ref, s_ref, b_ref, None, o_ref, acc_ref)
    return kernel


def fused_matmul(a, w, scale, shift, *, relu=False, sigmoid=False,
                 residual=None, out_dtype=jnp.bfloat16):
    """a: (M, K) bf16, w: (K, N) bf16, scale/shift: (N,) f32, residual: (M, N)."""
    M, K = a.shape
    Kw, N = w.shape
    assert K == Kw, (a.shape, w.shape)

    if M > TM_MAX:
        TM, M_pad = TM_MAX, _round_up(M, TM_MAX)
    else:
        TM, M_pad = M, M
    if K > TK_MAX:
        TK, K_pad = TK_MAX, _round_up(K, TK_MAX)
    else:
        TK, K_pad = K, K

    a_p = _pad2d(a, M_pad, K_pad)
    w_p = _pad2d(w, K_pad, N)
    scale = scale.reshape(1, N).astype(jnp.float32)
    shift = shift.reshape(1, N).astype(jnp.float32)

    in_specs = [
        pl.BlockSpec((TM, TK), lambda i, k: (i, k)),   # A tile
        pl.BlockSpec((TK, N), lambda i, k: (k, 0)),    # W tile
        pl.BlockSpec((1, N), lambda i, k: (0, 0)),     # BN scale (resident)
        pl.BlockSpec((1, N), lambda i, k: (0, 0)),     # BN shift / bias (resident)
    ]
    args = [a_p, w_p, scale, shift]
    res_bytes = 0
    if residual is not None:
        r_p = _pad2d(residual, M_pad, N)
        in_specs.append(pl.BlockSpec((TM, N), lambda i, k: (i, 0)))  # resident per i
        args.append(r_p)
        res_bytes = r_p.size * r_p.dtype.itemsize

    bytes_accessed = (a_p.size * a_p.dtype.itemsize
                      + w_p.size * w_p.dtype.itemsize
                      + M_pad * N * jnp.dtype(out_dtype).itemsize
                      + res_bytes)

    out = pl.pallas_call(
        _make_fused_kernel(relu, sigmoid, residual is not None),
        out_shape=jax.ShapeDtypeStruct((M_pad, N), out_dtype),
        grid=(M_pad // TM, K_pad // TK),
        in_specs=in_specs,
        out_specs=pl.BlockSpec((TM, N), lambda i, k: (i, 0)),
        scratch_shapes=[pltpu.VMEM((TM, N), jnp.float32)],
        compiler_params=pltpu.CompilerParams(
            dimension_semantics=("parallel", "arbitrary"),
            vmem_limit_bytes=32 * 1024 * 1024),
        cost_estimate=pl.CostEstimate(
            flops=2 * M_pad * K_pad * N,
            transcendentals=(M_pad * N) if sigmoid else 0,
            bytes_accessed=bytes_accessed),
    )(*args)
    return out[:M]


# ------------------------------------------------------------------
# GeM pooling kernel
# ------------------------------------------------------------------

def _gem_kernel(x_ref, o_ref, *, p, eps):
    x = x_ref[...].astype(jnp.float32)
    x = jnp.maximum(x, eps)                  # clamp(min=eps)
    pooled = jnp.mean(x * x * x, axis=1)     # p == 3 -> integer power on the VPU
    o_ref[...] = pooled ** (1.0 / p)         # transcendental only on (N, C)


def pallas_gem(x, p=3.0, eps=1e-6):
    """Generalized-mean pooling. x: (N, H*W, C) -> (N, C) f32."""
    assert p == 3.0  # cube is hard-coded as VPU multiplies
    N, HW, C = x.shape
    return pl.pallas_call(
        partial(_gem_kernel, p=p, eps=eps),
        out_shape=jax.ShapeDtypeStruct((N, C), jnp.float32),
        grid=(1,),
        in_specs=[pl.BlockSpec((N, HW, C), lambda i: (0, 0, 0))],
        out_specs=pl.BlockSpec((N, C), lambda i: (0, 0)),
    )(x)


# ------------------------------------------------------------------
# JAX glue: im2col, fused conv wrapper, maxpool, network assembly
# ------------------------------------------------------------------

def im2col(x, k, stride, pad):
    """x: (N, H, W, C) -> patches (N, Ho, Wo, k*k*C), tap-major channel order."""
    # TODO(synk): for large inputs, iterate the k*k taps as an extra K grid axis
    # inside the fused matmul instead of materializing k^2-expanded patches in HBM.
    N, H, W, C = x.shape
    if pad:
        x = jnp.pad(x, ((0, 0), (pad, pad), (pad, pad), (0, 0)))
    Ho = (H + 2 * pad - k) // stride + 1
    Wo = (W + 2 * pad - k) // stride + 1
    cols = []
    for di in range(k):
        for dj in range(k):
            cols.append(x[:, di:di + (Ho - 1) * stride + 1:stride,
                          dj:dj + (Wo - 1) * stride + 1:stride, :])
    return jnp.concatenate(cols, axis=-1), Ho, Wo


def conv_bn_act(x, w, bn, *, k, stride, pad, relu=True, residual=None):
    """Fused conv + BN scale/shift (+ residual) (+ ReLU) via one fused_matmul call.

    x: NHWC bf16.  w: (k*k*Cin, Cout) bf16 (tap-major rows matching im2col).
    residual: NHWC tensor at the output spatial size / channel count.
    """
    N = x.shape[0]
    if k == 1:
        if stride > 1:
            x = x[:, ::stride, ::stride, :]          # 1x1 stride-s conv == strided slice
        Ho, Wo, Cin = x.shape[1], x.shape[2], x.shape[3]
        a = x.reshape(N * Ho * Wo, Cin)
    else:
        patches, Ho, Wo = im2col(x, k, stride, pad)
        a = patches.reshape(N * Ho * Wo, -1)
    scale, shift = bn
    res2d = None
    if residual is not None:
        res2d = residual.reshape(N * Ho * Wo, -1)
    out = fused_matmul(a, w, scale, shift, relu=relu, residual=res2d)
    return out.reshape(N, Ho, Wo, -1)


def maxpool_3x3_s2(x):
    # TODO(synk): maxpool kept as lax.reduce_window glue (not the hot path).
    return jax.lax.reduce_window(
        x, jnp.array(-jnp.inf, x.dtype), jax.lax.max,
        (1, 3, 3, 1), (1, 2, 2, 1), ((0, 0), (1, 1), (1, 1), (0, 0)))


def _bn_scale_shift(key, c, eps=1e-5):
    """Inference BN folded to (scale, shift) f32 vectors."""
    k1, k2 = jax.random.split(key)
    gamma = 1.0 + 0.1 * jax.random.normal(k1, (c,), jnp.float32)
    beta = 0.1 * jax.random.normal(k2, (c,), jnp.float32)
    mean = jnp.zeros((c,), jnp.float32)
    var = jnp.ones((c,), jnp.float32)
    scale = gamma / jnp.sqrt(var + eps)
    shift = beta - mean * scale
    return scale, shift


def _block_diag_grouped_weight(key, width, groups, k=3):
    """Place per-group (k*k*cg, cg) weights into one lane-dense (k*k*width, width)
    matrix so the grouped conv runs as a single full-width MXU matmul."""
    cg = width // groups
    wg = jax.random.normal(key, (groups, k * k, cg, cg), jnp.float32) / math.sqrt(k * k * cg)
    w = jnp.zeros((k * k * width, width), jnp.float32)
    for g in range(groups):
        for t in range(k * k):
            w = w.at[t * width + g * cg:t * width + (g + 1) * cg,
                     g * cg:(g + 1) * cg].set(wg[g, t])
    return w.astype(jnp.bfloat16)


STAGE_CFG = [  # (cin, bottleneck_width, cout, stride) -- one block per stage
    (16, 32, 64, 1),
    (64, 64, 128, 2),
    (128, 128, 256, 2),
    (256, 256, 512, 2),
]


def init_params(key, num_classes, loss='focal'):
    keys = iter(jax.random.split(key, 64))
    params = {
        'stem_w': (jax.random.normal(next(keys), (7 * 7 * 3, 16), jnp.float32)
                   / math.sqrt(7 * 7 * 3)).astype(jnp.bfloat16),
        'stem_bn': _bn_scale_shift(next(keys), 16),
        'blocks': [],
    }
    for (cin, width, cout, stride) in STAGE_CFG:
        params['blocks'].append({
            'stride': stride,
            'w1': (jax.random.normal(next(keys), (cin, width), jnp.float32)
                   / math.sqrt(cin)).astype(jnp.bfloat16),
            'bn1': _bn_scale_shift(next(keys), width),
            'w2': _block_diag_grouped_weight(next(keys), width, CARDINALITY, 3),
            'bn2': _bn_scale_shift(next(keys), width),
            'w3': (jax.random.normal(next(keys), (width, cout), jnp.float32)
                   / math.sqrt(width)).astype(jnp.bfloat16),
            'bn3': _bn_scale_shift(next(keys), cout),
            'wd': (jax.random.normal(next(keys), (cin, cout), jnp.float32)
                   / math.sqrt(cin)).astype(jnp.bfloat16),
            'bnd': _bn_scale_shift(next(keys), cout),
        })
    fc_w = jax.random.normal(next(keys), (512, num_classes), jnp.float32) / math.sqrt(512)
    bias_val = -math.log((1 - 0.01) / 0.01) if loss == 'focal' else 0.0
    fc_b = jnp.full((num_classes,), bias_val, jnp.float32)
    n_pad = _round_up(num_classes, FC_PAD)               # lane-dense FC output
    params['fc_w'] = _pad2d(fc_w, 512, n_pad).astype(jnp.bfloat16)
    params['fc_b'] = jnp.pad(fc_b, (0, n_pad - num_classes))
    params['fc_scale'] = jnp.ones((n_pad,), jnp.float32)
    params['num_classes'] = num_classes
    return params


def resnext_forward(params, x_nchw, training=False):
    # NCHW -> NHWC; bf16 activations (MXU-native), f32 accumulation & epilogues.
    x = jnp.transpose(x_nchw, (0, 2, 3, 1)).astype(jnp.bfloat16)

    # ---- stem: 7x7 s2 conv + BN + ReLU (fused) + 3x3 s2 maxpool ----
    x = conv_bn_act(x, params['stem_w'], params['stem_bn'], k=7, stride=2, pad=3)
    x = maxpool_3x3_s2(x)

    # ---- ResNeXt bottleneck blocks (BN/ReLU/residual fused into conv epilogues) ----
    for blk in params['blocks']:
        identity = x
        out = conv_bn_act(x, blk['w1'], blk['bn1'], k=1, stride=1, pad=0)
        out = conv_bn_act(out, blk['w2'], blk['bn2'], k=3, stride=blk['stride'], pad=1)
        sc = conv_bn_act(identity, blk['wd'], blk['bnd'], k=1, stride=blk['stride'],
                         pad=0, relu=False)
        # conv3 + BN3 + residual add + ReLU all in one kernel epilogue.
        x = conv_bn_act(out, blk['w3'], blk['bn3'], k=1, stride=1, pad=0,
                        relu=True, residual=sc)

    # ---- GeM pooling + FC (+ sigmoid in eval mode, as in the PyTorch module) ----
    N, H, W, C = x.shape
    pooled = pallas_gem(x.reshape(N, H * W, C), p=3.0, eps=1e-6)        # (N, C) f32
    logits = fused_matmul(pooled.astype(jnp.bfloat16), params['fc_w'],
                          params['fc_scale'], params['fc_b'],
                          relu=False, sigmoid=not training,
                          out_dtype=jnp.float32)
    return logits[:, :params['num_classes']]


if __name__ == "__main__":
    key = jax.random.PRNGKey(0)
    pkey, xkey = jax.random.split(key)
    num_classes = 10
    params = init_params(pkey, num_classes, loss='focal')
    x = jax.random.normal(xkey, (2, 3, 32, 32), jnp.float32)   # NCHW like PyTorch

    out = resnext_forward(params, x, training=False)           # eval -> sigmoid applied
    out = jax.block_until_ready(out)

    assert out.shape == (2, num_classes), out.shape
    assert bool(jnp.all(jnp.isfinite(out)))
    assert bool(jnp.all((out >= 0.0) & (out <= 1.0)))          # sigmoid range
    print("KERNEL_OK")
</pallas_src>

<mosaic_0001>
module attributes {stable_mosaic.version = 11 : i64} {
  func.func @kernel(%arg0: i32, %arg1: i32, %arg2: memref<256x147xbf16, #tpu.memory_space<vmem>>, %arg3: memref<147x16xbf16, #tpu.memory_space<vmem>>, %arg4: memref<1x16xf32, #tpu.memory_space<vmem>>, %arg5: memref<1x16xf32, #tpu.memory_space<vmem>>, %arg6: memref<256x16xbf16, #tpu.memory_space<vmem>>, %arg7: memref<256x16xf32, #tpu.memory_space<vmem>>) attributes {dimension_semantics = [#tpu.dimension_semantics<parallel>, #tpu.dimension_semantics<arbitrary>], iteration_bounds = array<i64: 2, 1>, scalar_prefetch = 0 : i64, scratch_operands = 1 : i64, tpu.core_type = #tpu.core_type<tc>, window_params = [{transform_indices = @transform_0, window_bounds = array<i64: 256, 147>}, {transform_indices = @transform_1, window_bounds = array<i64: 147, 16>}, {pipeline_mode = #tpu.pipeline_mode<synchronous>, transform_indices = @transform_2, window_bounds = array<i64: 1, 16>}, {pipeline_mode = #tpu.pipeline_mode<synchronous>, transform_indices = @transform_3, window_bounds = array<i64: 1, 16>}, {transform_indices = @transform_4, window_bounds = array<i64: 256, 16>}]} {
    %c0_i32 = arith.constant 0 : i32
    %0 = arith.cmpi eq, %arg1, %c0_i32 : i32
    %1 = arith.extui %0 : i1 to i32
    %c0_i32_0 = arith.constant 0 : i32
    %2 = arith.cmpi ne, %1, %c0_i32_0 : i32
    scf.if %2 {
      %cst_10 = arith.constant 0.000000e+00 : f32
      %12 = vector.broadcast %cst_10 : f32 to vector<256x16xf32>
      %c0_11 = arith.constant 0 : index
      %c0_12 = arith.constant 0 : index
      %13 = vector.load %arg7[%c0_11, %c0_12] : memref<256x16xf32, #tpu.memory_space<vmem>>, vector<256x16xf32>
      tpu.vector_store %arg7[%c0_11, %c0_12], %12 {strides = array<i32>} : memref<256x16xf32, #tpu.memory_space<vmem>>, vector<256x16xf32>,
    } else {
    }
    %c0 = arith.constant 0 : index
    %c0_1 = arith.constant 0 : index
    %3 = vector.load %arg7[%c0, %c0_1] : memref<256x16xf32, #tpu.memory_space<vmem>>, vector<256x16xf32>
    %c0_2 = arith.constant 0 : index
    %c0_3 = arith.constant 0 : index
    %4 = vector.load %arg2[%c0_2, %c0_3] : memref<256x147xbf16, #tpu.memory_space<vmem>>, vector<256x147xbf16>
    %c0_4 = arith.constant 0 : index
    %c0_5 = arith.constant 0 : index
    %5 = vector.load %arg3[%c0_4, %c0_5] : memref<147x16xbf16, #tpu.memory_space<vmem>>, vector<147x16xbf16>
    %cst = arith.constant dense<0.000000e+00> : vector<256x16xf32>
    %6 = tpu.matmul %4, %5, %cst {dimension_numbers = #tpu.dot_dimension_numbers<[1], [0], [0], [1], [0, 0, 1, 1], [], []>} : vector<256x147xbf16>, vector<147x16xbf16>, vector<256x16xf32> -> vector<256x16xf32>
    %7 = arith.addf %3, %6 : vector<256x16xf32>
    %c0_6 = arith.constant 0 : index
    %c0_7 = arith.constant 0 : index
    %8 = vector.load %arg7[%c0_6, %c0_7] : memref<256x16xf32, #tpu.memory_space<vmem>>, vector<256x16xf32>
    tpu.vector_store %arg7[%c0_6, %c0_7], %7 {strides = array<i32>} : memref<256x16xf32, #tpu.memory_space<vmem>>, vector<256x16xf32>,
    %c0_i32_8 = arith.constant 0 : i32
    %9 = arith.cmpi eq, %arg1, %c0_i32_8 : i32
    %10 = arith.extui %9 : i1 to i32
    %c0_i32_9 = arith.constant 0 : i32
    %11 = arith.cmpi ne, %10, %c0_i32_9 : i32
    scf.if %11 {
      %c0_10 = arith.constant 0 : index
      %c0_11 = arith.constant 0 : index
      %12 = vector.load %arg7[%c0_10, %c0_11] : memref<256x16xf32, #tpu.memory_space<vmem>>, vector<256x16xf32>
      %c0_12 = arith.constant 0 : index
      %c0_13 = arith.constant 0 : index
      %13 = vector.load %arg4[%c0_12, %c0_13] : memref<1x16xf32, #tpu.memory_space<vmem>>, vector<1x16xf32>
      %14 = vector.broadcast %13 : vector<1x16xf32> to vector<256x16xf32>
      %15 = arith.mulf %12, %14 : vector<256x16xf32>
      %c0_14 = arith.constant 0 : index
      %c0_15 = arith.constant 0 : index
      %16 = vector.load %arg5[%c0_14, %c0_15] : memref<1x16xf32, #tpu.memory_space<vmem>>, vector<1x16xf32>
      %17 = vector.broadcast %16 : vector<1x16xf32> to vector<256x16xf32>
      %18 = arith.addf %15, %17 : vector<256x16xf32>
      %cst_16 = arith.constant 0.000000e+00 : f32
      %19 = vector.broadcast %cst_16 : f32 to vector<256x16xf32>
      %20 = arith.maximumf %18, %19 : vector<256x16xf32>
      %21 = arith.truncf %20 : vector<256x16xf32> to vector<256x16xbf16>
      %c0_17 = arith.constant 0 : index
      %c0_18 = arith.constant 0 : index
      %22 = vector.load %arg6[%c0_17, %c0_18] : memref<256x16xbf16, #tpu.memory_space<vmem>>, vector<256x16xbf16>
      tpu.vector_store %arg6[%c0_17, %c0_18], %21 {strides = array<i32>} : memref<256x16xbf16, #tpu.memory_space<vmem>>, vector<256x16xbf16>,
    } else {
    }
    return
  }
  func.func @transform_0(%arg0: i32, %arg1: i32) -> (i32, i32) {
    %c0_i32 = arith.constant 0 : i32
    return %arg0, %arg1 : i32, i32
  }
  func.func @transform_1(%arg0: i32, %arg1: i32) -> (i32, i32) {
    %c0_i32 = arith.constant 0 : i32
    %c0_i32_0 = arith.constant 0 : i32
    return %arg1, %c0_i32 : i32, i32
  }
  func.func @transform_2(%arg0: i32, %arg1: i32) -> (i32, i32) {
    %c0_i32 = arith.constant 0 : i32
    %c0_i32_0 = arith.constant 0 : i32
    %c0_i32_1 = arith.constant 0 : i32
    return %c0_i32, %c0_i32_0 : i32, i32
  }
  func.func @transform_3(%arg0: i32, %arg1: i32) -> (i32, i32) {
    %c0_i32 = arith.constant 0 : i32
    %c0_i32_0 = arith.constant 0 : i32
    %c0_i32_1 = arith.constant 0 : i32
    return %c0_i32, %c0_i32_0 : i32, i32
  }
  func.func @transform_4(%arg0: i32, %arg1: i32) -> (i32, i32) {
    %c0_i32 = arith.constant 0 : i32
    %c0_i32_0 = arith.constant 0 : i32
    return %arg0, %c0_i32 : i32, i32
  }
}

</mosaic_0001>

<bundles_post_ra>
// kernel: tpu_custom_call.1
= control target key start
LH: loop header
LB: loop body
LE: loop exit
PB: predicated region body
PF: predicated region fallthrough
CT: control target
= control target key end

     0   :  { %s1489_s15 = smov 0   ;;  %s1491_s16 = smov 0   ;;  %s1857_s0 = inlined_call_operand.vmem [shape: bf16[512,147], index: 0, kind: input, shape index: {}]   ;;  %s1858_s1 = inlined_call_operand.vmem [shape: bf16[147,16], index: 1, kind: input, shape index: {}]   ;;  %s1859_s2 = inlined_call_operand.vmem [shape: f32[1,16], index: 2, kind: input, shape index: {}]   ;;  %s1860_s3 = inlined_call_operand.vmem [shape: f32[1,16], index: 3, kind: input, shape index: {}]   ;;  %s1861_s4 = inlined_call_operand.vmem [shape: bf16[512,16], index: 4, kind: output, shape index: {}]  }
   0x1   :  { %s1493_s17 = smov 0  }
   0x2 LB: > { %s26_s18 = sadd.s32 1, %s1456_s16  ;;  %p1170_p0 = scmp.ge.s32.totalorder %s1460_s17, 1  ;;  %s1460_s17 = sphi %s1493_s17, %s14_s17   ;;  %s1456_s16 = sphi %s1491_s16, %s1863_s16   ;;  %s1452_s15 = sphi %s1489_s15, %s1862_s15  }
   0x3   : > { %p28_p1 = scmp.ge.s32.totalorder %s26_s18, 2  ;;  %p194_p2 = scmp.lt.s32.totalorder %s1460_s17, 3 }
   0x5   : > { %s1865_s18 = smov (%p28_p1, %s26_s18), 0  ;;  %p195_p3 = pnand %p1170_p0, %p194_p2 }
   0x6   : > { %s1171_s23 = sshll.u32 (!%p195_p3), %s1452_s15, 5 }
   0x7   : > { %198 = sbr.rel (%p195_p3) target bundleno = 318 (0x13e), region = 36  ;;  %p232_p4 = scmp.lt.s32.totalorder (!%p195_p3), %s1171_s23, 63 }
   0xc   : > { %v1398_v0 = vld [vmem:[%s1858_s1 + $0x38] sm:$0xff]  ;;  %v374_v1 = vld [vmem:[%s1858_s1 + $0x48] sm:$0x3]  ;;  %vm625_vm0 = vcmask 1040384   ;;  %vm626_vm1 = vcmask 1041408   ;;  %v1397_v3 = vld [vmem:[%s1858_s1 + $0x30] sm:$0xff] }
   0xd   : > { %v556_v2 = vunpack.c.l.b16 %v374_v1  ;;  %632 = vmatpush.bf16.msra.mxu0 %v1398_v0  ;;  %1400 = vmatpush.bf16.msra.mxu2 %v1398_v0  ;;  %v1462_v4 = vmov 65535   ;;  %s1867_s23 = smov (!%p232_p4, %s1171_s23), 63  ;;  %v1396_v9 = vld [vmem:[%s1858_s1 + $0x28] sm:$0xff]  ;;  %v1399_v10 = vld [vmem:[%s1858_s1 + $0x40] sm:$0xff]  ;;  %vm576_vm2 = vcmask 154624   ;;  %v1394_v18 = vld [vmem:[%s1858_s1 + $0x18] sm:$0xff] }
   0xe   : > { %v627_v5 = vsel %vm625_vm0, 4294967295, %v1462_v4  ;;  %s1358_s28 = sshll.u32 %s1867_s23, 3  ;;  %v1395_v14 = vld [vmem:[%s1858_s1 + $0x20] sm:$0xff]  ;;  %v1393_v19 = vld [vmem:[%s1858_s1 + $0x10] sm:$0xff]  ;;  %v1392_v20 = vld [vmem:[%s1858_s1 + $0x8] sm:$0xff]  ;;  %vm259_vm3 = vcmask 130048  }
   0xf   : > { %v566_v6 = vpack.c.b16 %v556_v2, %v556_v2  ;;  %v628_v7 = vsel %vm626_vm1, %v627_v5, 0  ;;  %s1528_s7 = scalar_lea.vmem %s1857_s0, %s1358_s28  ;;  %v1391_v26 = vld [vmem:[%s1858_s1] sm:$0xff]  ;;  %s1175_s26 = sshll.u32 %s1867_s23, 2  ;;  %vm1046_vm4 = vcmask 125952  }
  0x10   : > { %v1359_v11 = vld [vmem:[%s1528_s7 + $0x4] sm:$0xf]  ;;  %v1180_v12 = vld [vmem:[%s1528_s7 + $0x8] sm:$0xf0]  ;;  %v1377_v15 = vld [vmem:[%s1528_s7 + $0x94] sm:$0xf]  ;;  %s1679_s29 = scalar_lea.vmem %s1861_s4, %s1175_s26 }
  0x11   : > { %v630_v8 = vand.u32 %v628_v7, %v566_v6  ;;  %633 = vmatpush.bf16.msra.mxu0 %v1397_v3  ;;  %1401 = vmatpush.bf16.msra.mxu2 %v1397_v3  ;;  %v1183_v13 = vor.u32 %v1359_v11, %v1180_v12  ;;  %v1252_v16 = vld [vmem:[%s1528_s7 + $0x98] sm:$0xf0]  ;;  %v1361_v21 = vld [vmem:[%s1528_s7 + $0x14] sm:$0xf]  ;;  %v1379_v23 = vld [vmem:[%s1528_s7 + $0xa4] sm:$0xf] }
  0x12   : > { %v1255_v17 = vor.u32 %v1377_v15, %v1252_v16  ;;  %v1188_v22 = vld [vmem:[%s1528_s7 + $0x18] sm:$0xf0]  ;;  %v1260_v24 = vld [vmem:[%s1528_s7 + $0xa8] sm:$0xf0]  ;;  %v1178_v27 = vld [vmem:[%s1528_s7] sm:$0xf] }
  0x13   : > { %727 = vmatpush.bf16.msra.mxu1 %v630_v8  ;;  %1408 = vmatpush.bf16.msra.mxu3 %v630_v8  ;;  %v1191_v25 = vor.u32 %v1361_v21, %v1188_v22  ;;  %v1360_v28 = vld [vmem:[%s1528_s7 + $0x4] sm:$0xf0]  ;;  %v1242_v29 = vld [vmem:[%s1528_s7 + $0x80] sm:$0xf]  ;;  %v1263_v31 = vor.u32 %v1379_v23, %v1260_v24  ;;  %v1363_v34 = vld [vmem:[%s1528_s7 + $0x24] sm:$0xf] }
  0x14   : > { %v1376_v30 = vld [vmem:[%s1528_s7 + $0x84] sm:$0xf0]  ;;  %v1179_v32 = vor.u32 %v1360_v28, %v1178_v27  ;;  %v1196_v35 = vld [vmem:[%s1528_s7 + $0x28] sm:$0xf0]  ;;  %v1381_v36 = vld [vmem:[%s1528_s7 + $0xb4] sm:$0xf] }
  0x15   : > { %634 = vmatpush.bf16.msra.mxu0 %v1396_v9  ;;  %1402 = vmatpush.bf16.msra.mxu2 %v1396_v9  ;;  %v1243_v33 = vor.u32 %v1376_v30, %v1242_v29  ;;  %v1268_v37 = vld [vmem:[%s1528_s7 + $0xb8] sm:$0xf0]  ;;  %v1199_v38 = vor.u32 %v1363_v34, %v1196_v35  ;;  %v1186_v39 = vld [vmem:[%s1528_s7 + $0x10] sm:$0xf]  ;;  %v1362_v40 = vld [vmem:[%s1528_s7 + $0x14] sm:$0xf0] }
  0x16   : > { %v1250_v41 = vld [vmem:[%s1528_s7 + $0x90] sm:$0xf]  ;;  %v1378_v42 = vld [vmem:[%s1528_s7 + $0x94] sm:$0xf0]  ;;  %v1271_v43 = vor.u32 %v1381_v36, %v1268_v37  ;;  %v1187_v44 = vor.u32 %v1362_v40, %v1186_v39  ;;  %v1365_v46 = vld [vmem:[%s1528_s7 + $0x34] sm:$0xf] }
  0x17   : > { %728 = vmatpush.bf16.msra.mxu1 %v1399_v10  ;;  %1409 = vmatpush.bf16.msra.mxu3 %v1399_v10  ;;  %v1251_v45 = vor.u32 %v1378_v42, %v1250_v41  ;;  %v1204_v47 = vld [vmem:[%s1528_s7 + $0x38] sm:$0xf0]  ;;  %v1383_v48 = vld [vmem:[%s1528_s7 + $0xc4] sm:$0xf]  ;;  %v1276_v49 = vld [vmem:[%s1528_s7 + $0xc8] sm:$0xf0] }
  0x18   : > { %v1207_v50 = vor.u32 %v1365_v46, %v1204_v47  ;;  %v1194_v51 = vld [vmem:[%s1528_s7 + $0x20] sm:$0xf]  ;;  %v1364_v52 = vld [vmem:[%s1528_s7 + $0x24] sm:$0xf0]  ;;  %v1279_v55 = vor.u32 %v1383_v48, %v1276_v49  ;;  %v1367_v58 = vld [vmem:[%s1528_s7 + $0x44] sm:$0xf] }
  0x19   : > { %635 = vmatpush.bf16.msra.mxu0 %v1395_v14  ;;  %1403 = vmatpush.bf16.msra.mxu2 %v1395_v14  ;;  %v1258_v53 = vld [vmem:[%s1528_s7 + $0xa0] sm:$0xf]  ;;  %v1380_v54 = vld [vmem:[%s1528_s7 + $0xa4] sm:$0xf0]  ;;  %v1195_v56 = vor.u32 %v1364_v52, %v1194_v51  ;;  %v1212_v59 = vld [vmem:[%s1528_s7 + $0x48] sm:$0xf0] }
  0x1a   : > { %1340 = vmatmul.msk.bf16.vlgmr.msra.gmra.mxu1 %vm576_vm2, %v1183_v13  ;;  %1349 = vmatmul.msk.bf16.vlgmr.msra.gmra.mxu3 %vm576_vm2, %v1255_v17  ;;  %v1259_v57 = vor.u32 %v1380_v54, %v1258_v53  ;;  %v1385_v60 = vld [vmem:[%s1528_s7 + $0xd4] sm:$0xf]  ;;  %v1284_v61 = vld [vmem:[%s1528_s7 + $0xd8] sm:$0xf0]  ;;  %v1215_v62 = vor.u32 %v1367_v58, %v1212_v59  ;;  %v1202_v63 = vld [vmem:[%s1528_s7 + $0x30] sm:$0xf] }
  0x1b   : > { %v1366_v0 = vld [vmem:[%s1528_s7 + $0x34] sm:$0xf0]  ;;  %v1266_v1 = vld [vmem:[%s1528_s7 + $0xb0] sm:$0xf]  ;;  %v1287_v3 = vor.u32 %v1385_v60, %v1284_v61  ;;  %v1369_v6 = vld [vmem:[%s1528_s7 + $0x54] sm:$0xf] }
  0x1c   : > { %v1382_v2 = vld [vmem:[%s1528_s7 + $0xb4] sm:$0xf0]  ;;  %v1203_v4 = vor.u32 %v1366_v0, %v1202_v63  ;;  %v1220_v7 = vld [vmem:[%s1528_s7 + $0x58] sm:$0xf0]  ;;  %v1387_v8 = vld [vmem:[%s1528_s7 + $0xe4] sm:$0xf] }
  0x1d   : > { %636 = vmatpush.bf16.msra.mxu0 %v1394_v18  ;;  %1404 = vmatpush.bf16.msra.mxu2 %v1394_v18  ;;  %v1267_v5 = vor.u32 %v1382_v2, %v1266_v1  ;;  %v1292_v9 = vld [vmem:[%s1528_s7 + $0xe8] sm:$0xf0]  ;;  %v1223_v10 = vor.u32 %v1369_v6, %v1220_v7  ;;  %v1210_v11 = vld [vmem:[%s1528_s7 + $0x40] sm:$0xf]  ;;  %v1368_v12 = vld [vmem:[%s1528_s7 + $0x44] sm:$0xf0] }
  0x1e   : > { %v1274_v13 = vld [vmem:[%s1528_s7 + $0xc0] sm:$0xf]  ;;  %v1384_v14 = vld [vmem:[%s1528_s7 + $0xc4] sm:$0xf0]  ;;  %v1295_v15 = vor.u32 %v1387_v8, %v1292_v9  ;;  %v1211_v16 = vor.u32 %v1368_v12, %v1210_v11  ;;  %v1371_v18 = vld [vmem:[%s1528_s7 + $0x64] sm:$0xf] }
  0x1f   : > { %v1275_v17 = vor.u32 %v1384_v14, %v1274_v13  ;;  %v1300_v21 = vld [vmem:[%s1528_s7 + $0xf8] sm:$0xf0]  ;;  %v1218_v23 = vld [vmem:[%s1528_s7 + $0x50] sm:$0xf]  ;;  %v1370_v24 = vld [vmem:[%s1528_s7 + $0x54] sm:$0xf0] }
  0x20   : > { %v1219_v28 = vor.u32 %v1370_v24, %v1218_v23  ;;  %v1373_v30 = vld [vmem:[%s1528_s7 + $0x74] sm:$0xf]  ;;  %v1372_v34 = vld [vmem:[%s1528_s7 + $0x64] sm:$0xf0]  ;;  %v1463_v35 = vmov 0.0  }
  0x21   : > { %637 = vmatpush.bf16.msra.mxu0 %v1393_v19  ;;  %1405 = vmatpush.bf16.msra.mxu2 %v1393_v19  ;;  %v1228_v19 = vld [vmem:[%s1528_s7 + $0x68] sm:$0xf0]  ;;  %260 = vst.msk [vmem:[#allocation2] sm:$0xff] %vm259_vm3, %v1463_v35  ;;  %v1290_v36 = vld [vmem:[%s1528_s7 + $0xe0] sm:$0xf] }
  0x22   : > { %v1231_v22 = vor.u32 %v1371_v18, %v1228_v19  ;;  %v1388_v37 = vld [vmem:[%s1528_s7 + $0xe4] sm:$0xf0]  ;;  %261 = vst.msk [vmem:[#allocation2 + $0x8] sm:$0xff] %vm259_vm3, %v1463_v35  ;;  %v1375_v40 = vld [vmem:[%s1528_s7 + $0x84] sm:$0xf] }
  0x23   : > { %262 = vst.msk [vmem:[#allocation2 + $0x10] sm:$0xff] %vm259_vm3, %v1463_v35  ;;  %v1291_v39 = vor.u32 %v1388_v37, %v1290_v36  ;;  %v1244_v41 = vld [vmem:[%s1528_s7 + $0x88] sm:$0xf0]  ;;  %v1298_v46 = vld [vmem:[%s1528_s7 + $0xf0] sm:$0xf] }
  0x24   : > { %263 = vst.msk [vmem:[#allocation2 + $0x18] sm:$0xff] %vm259_vm3, %v1463_v35  ;;  %v1247_v42 = vor.u32 %v1375_v40, %v1244_v41  ;;  %v1390_v47 = vld [vmem:[%s1528_s7 + $0xf4] sm:$0xf0]  ;;  %v1668_v0 = vld [vmem:[%s1860_s3] ss:$0 sm:$0xff] }
  0x25   : > { %638 = vmatpush.bf16.msra.mxu0 %v1392_v20  ;;  %1406 = vmatpush.bf16.msra.mxu2 %v1392_v20  ;;  %v1389_v20 = vld [vmem:[%s1528_s7 + $0xf4] sm:$0xf]  ;;  %264 = vst.msk [vmem:[#allocation2 + $0x20] sm:$0xff] %vm259_vm3, %v1463_v35  ;;  %v1299_v49 = vor.u32 %v1390_v47, %v1298_v46 }
  0x26   : > { %v1303_v27 = vor.u32 %v1389_v20, %v1300_v21  ;;  %265 = vst.msk [vmem:[#allocation2 + $0x28] sm:$0xff] %vm259_vm3, %v1463_v35 }
  0x27   : > { %266 = vst.msk [vmem:[#allocation2 + $0x30] sm:$0xff] %vm259_vm3, %v1463_v35 }
  0x28   : > { %267 = vst.msk [vmem:[#allocation2 + $0x38] sm:$0xff] %vm259_vm3, %v1463_v35  ;;  %v292_v53 = vld [vmem:[#allocation2] sm:$0xff] }
  0x29   : > { %639 = vmatpush.bf16.msra.mxu0 %v1391_v26  ;;  %1407 = vmatpush.bf16.msra.mxu2 %v1391_v26  ;;  %v1386_v26 = vld [vmem:[%s1528_s7 + $0xd4] sm:$0xf0]  ;;  %268 = vst.msk [vmem:[#allocation2 + $0x40] sm:$0xff] %vm259_vm3, %v1463_v35  ;;  %v293_v60 = vld [vmem:[#allocation2 + $0x8] sm:$0xff] }
  0x2a   : > { %1341 = vmatmul.msk.bf16.gmra.mxu1 %vm576_vm2, %v1191_v25  ;;  %1350 = vmatmul.msk.bf16.gmra.mxu3 %vm576_vm2, %v1263_v31  ;;  %v1282_v25 = vld [vmem:[%s1528_s7 + $0xd0] sm:$0xf]  ;;  %v1236_v31 = vld [vmem:[%s1528_s7 + $0x78] sm:$0xf0]  ;;  %269 = vst.msk [vmem:[#allocation2 + $0x48] sm:$0xff] %vm259_vm3, %v1463_v35 }
  0x2b   : > { %v1283_v29 = vor.u32 %v1386_v26, %v1282_v25  ;;  %270 = vst.msk [vmem:[#allocation2 + $0x50] sm:$0xff] %vm259_vm3, %v1463_v35  ;;  %v294_v7 = vld [vmem:[#allocation2 + $0x10] sm:$0xff]  ;;  %v295_v21 = vld [vmem:[#allocation2 + $0x18] sm:$0xff] }
  0x2c   : > { %640 = vmatmul.bf16.vlgmr.msra.gmra.mxu0 %v1179_v32  ;;  %680 = vmatmul.bf16.vlgmr.msra.gmra.mxu2 %v1243_v33  ;;  %v1239_v32 = vor.u32 %v1373_v30, %v1236_v31  ;;  %v1226_v33 = vld [vmem:[%s1528_s7 + $0x60] sm:$0xf]  ;;  %271 = vst.msk [vmem:[#allocation2 + $0x58] sm:$0xff] %vm259_vm3, %v1463_v35 }
  0x2d   : > { %272 = vst.msk [vmem:[#allocation2 + $0x60] sm:$0xff] %vm259_vm3, %v1463_v35  ;;  %v296_v36 = vld [vmem:[#allocation2 + $0x20] sm:$0xff] }
  0x2e   : > { %273 = vst.msk [vmem:[#allocation2 + $0x68] sm:$0xff] %vm259_vm3, %v1463_v35 }
  0x2f   : > { %274 = vst.msk [vmem:[#allocation2 + $0x70] sm:$0xff] %vm259_vm3, %v1463_v35 }
  0x30   : > { %275 = vst.msk [vmem:[#allocation2 + $0x78] sm:$0xff] %vm259_vm3, %v1463_v35 }
  0x31   : > { %276 = vst.msk [vmem:[#allocation2 + $0x80] sm:$0xff] %vm259_vm3, %v1463_v35 }
  0x32   : > { %277 = vst.msk [vmem:[#allocation2 + $0x88] sm:$0xff] %vm259_vm3, %v1463_v35 }
  0x33   : > { %278 = vst.msk [vmem:[#allocation2 + $0x90] sm:$0xff] %vm259_vm3, %v1463_v35 }
  0x34   : > { %279 = vst.msk [vmem:[#allocation2 + $0x98] sm:$0xff] %vm259_vm3, %v1463_v35 }
  0x35   : > { %280 = vst.msk [vmem:[#allocation2 + $0xa0] sm:$0xff] %vm259_vm3, %v1463_v35 }
  0x36   : > { %281 = vst.msk [vmem:[#allocation2 + $0xa8] sm:$0xff] %vm259_vm3, %v1463_v35 }
  0x37   : > { %282 = vst.msk [vmem:[#allocation2 + $0xb0] sm:$0xff] %vm259_vm3, %v1463_v35 }
  0x38   : > { %283 = vst.msk [vmem:[#allocation2 + $0xb8] sm:$0xff] %vm259_vm3, %v1463_v35 }
  0x39   : > { %284 = vst.msk [vmem:[#allocation2 + $0xc0] sm:$0xff] %vm259_vm3, %v1463_v35 }
  0x3a   : > { %1342 = vmatmul.msk.bf16.gmra.mxu1 %vm576_vm2, %v1199_v38  ;;  %1351 = vmatmul.msk.bf16.gmra.mxu3 %vm576_vm2, %v1271_v43  ;;  %v1227_v38 = vor.u32 %v1372_v34, %v1226_v33  ;;  %v1234_v43 = vld [vmem:[%s1528_s7 + $0x70] sm:$0xf]  ;;  %285 = vst.msk [vmem:[#allocation2 + $0xc8] sm:$0xff] %vm259_vm3, %v1463_v35 }
  0x3b   : > { %286 = vst.msk [vmem:[#allocation2 + $0xd0] sm:$0xff] %vm259_vm3, %v1463_v35  ;;  %v310_v18 = vld [vmem:[#allocation2 + $0x90] sm:$0xff] }
  0x3c   : > { %645 = vmatmul.bf16.gmra.mxu0 %v1187_v44  ;;  %685 = vmatmul.bf16.gmra.mxu2 %v1251_v45  ;;  %v1374_v44 = vld [vmem:[%s1528_s7 + $0x74] sm:$0xf0]  ;;  %287 = vst.msk [vmem:[#allocation2 + $0xd8] sm:$0xff] %vm259_vm3, %v1463_v35 }
  0x3d   : > { %v1235_v48 = vor.u32 %v1374_v44, %v1234_v43  ;;  %288 = vst.msk [vmem:[#allocation2 + $0xe0] sm:$0xff] %vm259_vm3, %v1463_v35 }
  0x3e   : > { %289 = vst.msk [vmem:[#allocation2 + $0xe8] sm:$0xff] %vm259_vm3, %v1463_v35 }
  0x3f   : > { %290 = vst.msk [vmem:[#allocation2 + $0xf0] sm:$0xff] %vm259_vm3, %v1463_v35 }
  0x40   : > { %291 = vst.msk [vmem:[#allocation2 + $0xf8] sm:$0xff] %vm259_vm3, %v1463_v35 }
  0x4a   : > { %1343 = vmatmul.msk.bf16.gmra.mxu1 %vm576_vm2, %v1207_v50  ;;  %1352 = vmatmul.msk.bf16.gmra.mxu3 %vm576_vm2, %v1279_v55 }
  0x4c   : > { %650 = vmatmul.bf16.gmra.mxu0 %v1195_v56  ;;  %690 = vmatmul.bf16.gmra.mxu2 %v1259_v57 }
  0x5a   : > { %1344 = vmatmul.msk.bf16.gmra.mxu1 %vm576_vm2, %v1215_v62  ;;  %1353 = vmatmul.msk.bf16.gmra.mxu3 %vm576_vm2, %v1287_v3  ;;  %v1663_v62 = vld [vmem:[%s1859_s2] ss:$0 sm:$0xff] }
  0x5c   : > { %655 = vmatmul.bf16.gmra.mxu0 %v1203_v4  ;;  %695 = vmatmul.bf16.gmra.mxu2 %v1267_v5 }
  0x6a   : > { %1345 = vmatmul.msk.bf16.gmra.mxu1 %vm576_vm2, %v1223_v10  ;;  %1354 = vmatmul.msk.bf16.gmra.mxu3 %vm576_vm2, %v1295_v15 }
  0x6c   : > { %660 = vmatmul.bf16.gmra.mxu0 %v1211_v16  ;;  %700 = vmatmul.bf16.gmra.mxu2 %v1275_v17 }
  0x7a   : > { %1346 = vmatmul.msk.bf16.gmra.mxu1 %vm576_vm2, %v1231_v22  ;;  %1355 = vmatmul.msk.bf16.gmra.mxu3 %vm576_vm2, %v1303_v27 }
  0x7c   : > { %665 = vmatmul.bf16.gmra.mxu0 %v1219_v28  ;;  %705 = vmatmul.bf16.gmra.mxu2 %v1283_v29 }
  0x8a   : > { %1347 = vmatmul.msk.bf16.gmra.mxu1 %vm576_vm2, %v1239_v32  ;;  %v311_v32 = vld [vmem:[#allocation2 + $0x98] sm:$0xff] }
  0x8c   : > { %670 = vmatmul.bf16.gmra.mxu0 %v1227_v38  ;;  %710 = vmatmul.bf16.gmra.mxu2 %v1291_v39 }
  0x97   : > { %v730_v45 = vpop.f32.mrf.mxu1 }
  0x9a   : > { %1348 = vmatmul.msk.bf16.gmra.mxu1 %vm576_vm2, %v1247_v42 }
  0x9c   : > { %675 = vmatmul.bf16.gmra.mxu0 %v1235_v48  ;;  %715 = vmatmul.bf16.gmra.mxu2 %v1299_v49 }
  0x9d   : > { %v775_v52 = vpop.f32.mrf.mxu3 }
  0x9f   : > { %v732_v50 = vpop.f32.mrf.mxu1 }
  0xa5   : > { %v777_v59 = vpop.f32.mrf.mxu3 }
  0xa7   : > { %v735_v51 = vpop.f32.mrf.mxu1 }
  0xa9   : > { %v641_v54 = vpop.f32.mrf.mxu0 }
  0xaa   : > { %v731_v55 = vadd.f32 %v730_v45, %v641_v54 }
  0xac   : > { %v810_v56 = vadd.f32 %v731_v55, %v292_v53  ;;  %v297_v55 = vld [vmem:[#allocation2 + $0x28] sm:$0xff] }
  0xad   : > { %v780_v11 = vpop.f32.mrf.mxu3 }
  0xae   : > { %843 = vst.msk [vmem:[#allocation2] sm:$0xff] %vm259_vm3, %v810_v56 }
  0xaf   : > { %v737_v57 = vpop.f32.mrf.mxu1  ;;  %v1658_v58 = vpop.f32.mrf.mxu2 }
  0xb1   : > { %v643_v61 = vpop.f32.mrf.mxu0 }
  0xb2   : > { %v733_v63 = vadd.f32 %v732_v50, %v643_v61  ;;  %v312_v50 = vld [vmem:[#allocation2 + $0xa0] sm:$0xff] }
  0xb4   : > { %v811_v1 = vadd.f32 %v733_v63, %v293_v60 }
  0xb5   : > { %v878_v2 = vld [vmem:[#allocation2] sm:$0xff]  ;;  %v782_v28 = vpop.f32.mrf.mxu3 }
  0xb6   : > { %v914_v3 = vmul.f32 %v1663_v62, %v878_v2  ;;  %844 = vst.msk [vmem:[#allocation2 + $0x8] sm:$0xff] %vm259_vm3, %v811_v1 }
  0xb7   : > { %v740_v4 = vpop.f32.mrf.mxu1  ;;  %v1674_v6 = vpop.f32.mrf.mxu2 }
  0xb8   : > { %v950_v5 = vadd.f32 %v1668_v0, %v914_v3 }
  0xb9   : > { %v646_v8 = vpop.f32.mrf.mxu0 }
  0xba   : > { %v982_v9 = vmax.f32 %v950_v5, 0.0  ;;  %v736_v10 = vadd.f32 %v735_v51, %v646_v8 }
  0xbc   : > { %v1014_v12 = vpack.c.bf16 %v982_v9, %v982_v9  ;;  %v812_v13 = vadd.f32 %v736_v10, %v294_v7  ;;  %v313_v10 = vld [vmem:[#allocation2 + $0xa8] sm:$0xff] }
  0xbd   : > { %v879_v14 = vld [vmem:[#allocation2 + $0x8] sm:$0xff]  ;;  %v785_v47 = vpop.f32.mrf.mxu3 }
  0xbe   : > { %1047 = vst.msk [vmem:[%s1679_s29] sm:$0xf] %vm1046_vm4, %v1014_v12  ;;  %v915_v15 = vmul.f32 %v1663_v62, %v879_v14 }
  0xbf   : > { %v742_v16 = vpop.f32.mrf.mxu1  ;;  %845 = vst.msk [vmem:[#allocation2 + $0x10] sm:$0xff] %vm259_vm3, %v812_v13  ;;  %v686_v19 = vpop.f32.mrf.mxu2 }
  0xc0   : > { %v951_v17 = vadd.f32 %v1668_v0, %v915_v15  ;;  %v776_v20 = vadd.f32 %v775_v52, %v686_v19  ;;  %v298_v15 = vld [vmem:[#allocation2 + $0x30] sm:$0xff] }
  0xc1   : > { %v648_v22 = vpop.f32.mrf.mxu0 }
  0xc2   : > { %v983_v23 = vmax.f32 %v951_v17, 0.0  ;;  %v738_v24 = vadd.f32 %v737_v57, %v648_v22  ;;  %v828_v25 = vadd.f32 %v776_v20, %v310_v18 }
  0xc4   : > { %v1015_v26 = vpack.c.bf16 %v983_v23, %v983_v23  ;;  %v813_v27 = vadd.f32 %v738_v24, %v295_v21  ;;  %861 = vst.msk [vmem:[#allocation2 + $0x90] sm:$0xff] %vm259_vm3, %v828_v25 }
  0xc5   : > { %v787_v12 = vpop.f32.mrf.mxu3 }
  0xc6   : > { %1048 = vst.msk [vmem:[%s1679_s29 + $0x4] sm:$0xf] %vm1046_vm4, %v1015_v26  ;;  %v880_v29 = vld [vmem:[#allocation2 + $0x10] sm:$0xff] }
  0xc7   : > { %v745_v30 = vpop.f32.mrf.mxu1  ;;  %v916_v31 = vmul.f32 %v1663_v62, %v880_v29  ;;  %846 = vst.msk [vmem:[#allocation2 + $0x18] sm:$0xff] %vm259_vm3, %v813_v27  ;;  %v688_v33 = vpop.f32.mrf.mxu2  ;;  %v314_v29 = vld [vmem:[#allocation2 + $0xb0] sm:$0xff] }
  0xc8   : > { %v778_v35 = vadd.f32 %v777_v59, %v688_v33 }
  0xc9   : > { %v952_v34 = vadd.f32 %v1668_v0, %v916_v31  ;;  %v651_v37 = vpop.f32.mrf.mxu0 }
  0xca   : > { %v741_v38 = vadd.f32 %v740_v4, %v651_v37  ;;  %v829_v40 = vadd.f32 %v778_v35, %v311_v32  ;;  %v299_v32 = vld [vmem:[#allocation2 + $0x38] sm:$0xff] }
  0xcb   : > { %v984_v39 = vmax.f32 %v952_v34, 0.0  ;;  %v896_v41 = vld [vmem:[#allocation2 + $0x90] sm:$0xff] }
  0xcc   : > { %v814_v42 = vadd.f32 %v741_v38, %v296_v36  ;;  %v932_v44 = vmul.f32 %v1663_v62, %v896_v41  ;;  %862 = vst.msk [vmem:[#allocation2 + $0x98] sm:$0xff] %vm259_vm3, %v829_v40 }
  0xcd   : > { %v1016_v43 = vpack.c.bf16 %v984_v39, %v984_v39  ;;  %v790_v37 = vpop.f32.mrf.mxu3 }
  0xce   : > { %v881_v45 = vld [vmem:[#allocation2 + $0x18] sm:$0xff]  ;;  %847 = vst.msk [vmem:[#allocation2 + $0x20] sm:$0xff] %vm259_vm3, %v814_v42  ;;  %v968_v48 = vadd.f32 %v1668_v0, %v932_v44 }
  0xcf   : > { %v747_v46 = vpop.f32.mrf.mxu1  ;;  %1049 = vst.msk [vmem:[%s1679_s29 + $0x8] sm:$0xf] %vm1046_vm4, %v1016_v43  ;;  %v917_v49 = vmul.f32 %v1663_v62, %v881_v45  ;;  %v691_v51 = vpop.f32.mrf.mxu2 }
  0xd0   : > { %v1000_v52 = vmax.f32 %v968_v48, 0.0  ;;  %v781_v54 = vadd.f32 %v780_v11, %v691_v51  ;;  %v315_v48 = vld [vmem:[#allocation2 + $0xb8] sm:$0xff] }
  0xd1   : > { %v953_v53 = vadd.f32 %v1668_v0, %v917_v49  ;;  %v653_v56 = vpop.f32.mrf.mxu0 }
  0xd2   : > { %v743_v57 = vadd.f32 %v742_v16, %v653_v56  ;;  %v1032_v59 = vpack.c.bf16 %v1000_v52, %v1000_v52  ;;  %v830_v61 = vadd.f32 %v781_v54, %v312_v50  ;;  %v300_v52 = vld [vmem:[#allocation2 + $0x40] sm:$0xff] }
  0xd3   : > { %v985_v60 = vmax.f32 %v953_v53, 0.0  ;;  %v897_v63 = vld [vmem:[#allocation2 + $0x98] sm:$0xff] }
  0xd4   : > { %v815_v1 = vadd.f32 %v743_v57, %v297_v55  ;;  %1065 = vst.msk [vmem:[%s1679_s29 + $0x48] sm:$0xf] %vm1046_vm4, %v1032_v59  ;;  %v933_v3 = vmul.f32 %v1663_v62, %v897_v63 }
  0xd5   : > { %v1017_v2 = vpack.c.bf16 %v985_v60, %v985_v60  ;;  %v882_v4 = vld [vmem:[#allocation2 + $0x20] sm:$0xff]  ;;  %863 = vst.msk [vmem:[#allocation2 + $0xa0] sm:$0xff] %vm259_vm3, %v830_v61  ;;  %v792_v63 = vpop.f32.mrf.mxu3 }
  0xd6   : > { %v918_v5 = vmul.f32 %v1663_v62, %v882_v4  ;;  %v969_v8 = vadd.f32 %v1668_v0, %v933_v3  ;;  %848 = vst.msk [vmem:[#allocation2 + $0x28] sm:$0xff] %vm259_vm3, %v815_v1 }
  0xd7   : > { %v750_v7 = vpop.f32.mrf.mxu1  ;;  %1050 = vst.msk [vmem:[%s1679_s29 + $0xc] sm:$0xf] %vm1046_vm4, %v1017_v2  ;;  %v693_v11 = vpop.f32.mrf.mxu2 }
  0xd8   : > { %v954_v9 = vadd.f32 %v1668_v0, %v918_v5  ;;  %v1001_v13 = vmax.f32 %v969_v8, 0.0  ;;  %v783_v14 = vadd.f32 %v782_v28, %v693_v11 }
  0xd9   : > { %v656_v16 = vpop.f32.mrf.mxu0 }
  0xda   : > { %v986_v17 = vmax.f32 %v954_v9, 0.0  ;;  %v746_v18 = vadd.f32 %v745_v30, %v656_v16  ;;  %v1033_v19 = vpack.c.bf16 %v1001_v13, %v1001_v13  ;;  %v831_v20 = vadd.f32 %v783_v14, %v313_v10  ;;  %v316_v9 = vld [vmem:[#allocation2 + $0xc0] sm:$0xff]  ;;  %v301_v14 = vld [vmem:[#allocation2 + $0x48] sm:$0xff] }
  0xdc   : > { %v1018_v21 = vpack.c.bf16 %v986_v17, %v986_v17  ;;  %v816_v22 = vadd.f32 %v746_v18, %v298_v15  ;;  %1066 = vst.msk [vmem:[%s1679_s29 + $0x4c] sm:$0xf] %vm1046_vm4, %v1033_v19  ;;  %v898_v23 = vld [vmem:[#allocation2 + $0xa0] sm:$0xff] }
  0xdd   : > { %v934_v24 = vmul.f32 %v1663_v62, %v898_v23  ;;  %v883_v26 = vld [vmem:[#allocation2 + $0x28] sm:$0xff]  ;;  %864 = vst.msk [vmem:[#allocation2 + $0xa8] sm:$0xff] %vm259_vm3, %v831_v20 }
  0xde   : > { %1051 = vst.msk [vmem:[%s1679_s29 + $0x10] sm:$0xf] %vm1046_vm4, %v1018_v21  ;;  %v919_v28 = vmul.f32 %v1663_v62, %v883_v26 }
  0xdf   : > { %v752_v25 = vpop.f32.mrf.mxu1  ;;  %v970_v27 = vadd.f32 %v1668_v0, %v934_v24  ;;  %849 = vst.msk [vmem:[#allocation2 + $0x30] sm:$0xff] %vm259_vm3, %v816_v22  ;;  %v696_v30 = vpop.f32.mrf.mxu2 }
  0xe0   : > { %v786_v31 = vadd.f32 %v785_v47, %v696_v30  ;;  %v955_v35 = vadd.f32 %v1668_v0, %v919_v28  ;;  %v795_v28 = vpop.f32.mrf.mxu3  ;;  %v317_v30 = vld [vmem:[#allocation2 + $0xc8] sm:$0xff] }
  0xe1   : > { %v658_v33 = vpop.f32.mrf.mxu0  ;;  %v1002_v34 = vmax.f32 %v970_v27, 0.0 }
  0xe2   : > { %v748_v36 = vadd.f32 %v747_v46, %v658_v33  ;;  %v832_v38 = vadd.f32 %v786_v31, %v314_v29  ;;  %v987_v40 = vmax.f32 %v955_v35, 0.0 }
  0xe3   : > { %v1034_v39 = vpack.c.bf16 %v1002_v34, %v1002_v34  ;;  %v302_v34 = vld [vmem:[#allocation2 + $0x50] sm:$0xff] }
  0xe4   : > { %v817_v41 = vadd.f32 %v748_v36, %v299_v32  ;;  %865 = vst.msk [vmem:[#allocation2 + $0xb0] sm:$0xff] %vm259_vm3, %v832_v38  ;;  %v1019_v42 = vpack.c.bf16 %v987_v40, %v987_v40  ;;  %v899_v43 = vld [vmem:[#allocation2 + $0xa8] sm:$0xff] }
  0xe5   : > { %1067 = vst.msk [vmem:[%s1679_s29 + $0x50] sm:$0xf] %vm1046_vm4, %v1034_v39  ;;  %v935_v45 = vmul.f32 %v1663_v62, %v899_v43 }
  0xe6   : > { %v884_v47 = vld [vmem:[#allocation2 + $0x30] sm:$0xff]  ;;  %850 = vst.msk [vmem:[#allocation2 + $0x38] sm:$0xff] %vm259_vm3, %v817_v41 }
  0xe7   : > { %v1723_v44 = vpop.f32.mrf.mxu1  ;;  %1052 = vst.msk [vmem:[%s1679_s29 + $0x14] sm:$0xf] %vm1046_vm4, %v1019_v42  ;;  %v920_v46 = vmul.f32 %v1663_v62, %v884_v47  ;;  %v698_v49 = vpop.f32.mrf.mxu2  ;;  %v971_v50 = vadd.f32 %v1668_v0, %v935_v45 }
  0xe8   : > { %v788_v51 = vadd.f32 %v787_v12, %v698_v49 }
  0xe9   : > { %v661_v53 = vpop.f32.mrf.mxu0  ;;  %v956_v54 = vadd.f32 %v1668_v0, %v920_v46  ;;  %v1003_v56 = vmax.f32 %v971_v50, 0.0  ;;  %v797_v50 = vpop.f32.mrf.mxu3 }
  0xea   : > { %v751_v55 = vadd.f32 %v750_v7, %v661_v53  ;;  %v833_v57 = vadd.f32 %v788_v51, %v315_v48 }
  0xeb   : > { %v988_v59 = vmax.f32 %v956_v54, 0.0  ;;  %v900_v60 = vld [vmem:[#allocation2 + $0xb0] sm:$0xff]  ;;  %v1035_v1 = vpack.c.bf16 %v1003_v56, %v1003_v56 }
  0xec   : > { %v818_v61 = vadd.f32 %v751_v55, %v300_v52  ;;  %v936_v2 = vmul.f32 %v1663_v62, %v900_v60  ;;  %866 = vst.msk [vmem:[#allocation2 + $0xb8] sm:$0xff] %vm259_vm3, %v833_v57  ;;  %v303_v52 = vld [vmem:[#allocation2 + $0x58] sm:$0xff] }
  0xed   : > { %v1020_v3 = vpack.c.bf16 %v988_v59, %v988_v59  ;;  %v885_v4 = vld [vmem:[#allocation2 + $0x38] sm:$0xff]  ;;  %1068 = vst.msk [vmem:[%s1679_s29 + $0x54] sm:$0xf] %vm1046_vm4, %v1035_v1 }
  0xee   : > { %851 = vst.msk [vmem:[#allocation2 + $0x40] sm:$0xff] %vm259_vm3, %v818_v61  ;;  %v972_v7 = vadd.f32 %v1668_v0, %v936_v2  ;;  %v921_v8 = vmul.f32 %v1663_v62, %v885_v4 }
  0xef   : > { %v757_v5 = vpop.f32.mrf.mxu1  ;;  %1053 = vst.msk [vmem:[%s1679_s29 + $0x18] sm:$0xf] %vm1046_vm4, %v1020_v3  ;;  %v701_v10 = vpop.f32.mrf.mxu2 }
  0xf0   : > { %v1004_v11 = vmax.f32 %v972_v7, 0.0  ;;  %v957_v12 = vadd.f32 %v1668_v0, %v921_v8  ;;  %v791_v13 = vadd.f32 %v790_v37, %v701_v10  ;;  %v319_v7 = vld [vmem:[#allocation2 + $0xd8] sm:$0xff] }
  0xf1   : > { %v663_v15 = vpop.f32.mrf.mxu0 }
  0xf2   : > { %v753_v16 = vadd.f32 %v752_v25, %v663_v15  ;;  %v1036_v17 = vpack.c.bf16 %v1004_v11, %v1004_v11  ;;  %v989_v18 = vmax.f32 %v957_v12, 0.0  ;;  %v834_v19 = vadd.f32 %v791_v13, %v316_v9  ;;  %v304_v11 = vld [vmem:[#allocation2 + $0x60] sm:$0xff] }
  0xf3   : > { %v901_v20 = vld [vmem:[#allocation2 + $0xb8] sm:$0xff] }
  0xf4   : > { %v819_v21 = vadd.f32 %v753_v16, %v301_v14  ;;  %1069 = vst.msk [vmem:[%s1679_s29 + $0x58] sm:$0xf] %vm1046_vm4, %v1036_v17  ;;  %v1021_v22 = vpack.c.bf16 %v989_v18, %v989_v18  ;;  %v937_v23 = vmul.f32 %v1663_v62, %v901_v20  ;;  %v800_v14 = vpop.f32.mrf.mxu3 }
  0xf5   : > { %v886_v24 = vld [vmem:[#allocation2 + $0x40] sm:$0xff]  ;;  %867 = vst.msk [vmem:[#allocation2 + $0xc0] sm:$0xff] %vm259_vm3, %v834_v19 }
  0xf6   : > { %v922_v26 = vmul.f32 %v1663_v62, %v886_v24  ;;  %1054 = vst.msk [vmem:[%s1679_s29 + $0x1c] sm:$0xf] %vm1046_vm4, %v1021_v22  ;;  %v973_v25 = vadd.f32 %v1668_v0, %v937_v23 }
  0xf7   : > { %v760_v27 = vpop.f32.mrf.mxu1  ;;  %852 = vst.msk [vmem:[#allocation2 + $0x48] sm:$0xff] %vm259_vm3, %v819_v21  ;;  %v703_v31 = vpop.f32.mrf.mxu2 }
  0xf8   : > { %v958_v29 = vadd.f32 %v1668_v0, %v922_v26  ;;  %v1005_v32 = vmax.f32 %v973_v25, 0.0  ;;  %v793_v33 = vadd.f32 %v792_v63, %v703_v31  ;;  %v320_v25 = vld [vmem:[#allocation2 + $0xe0] sm:$0xff] }
  0xf9   : > { %v666_v35 = vpop.f32.mrf.mxu0 }
  0xfa   : > { %v990_v36 = vmax.f32 %v958_v29, 0.0  ;;  %v756_v37 = vadd.f32 %v1723_v44, %v666_v35  ;;  %v1037_v38 = vpack.c.bf16 %v1005_v32, %v1005_v32  ;;  %v835_v39 = vadd.f32 %v793_v33, %v317_v30  ;;  %v318_v44 = vld [vmem:[#allocation2 + $0xd0] sm:$0xff]  ;;  %v305_v33 = vld [vmem:[#allocation2 + $0x68] sm:$0xff] }
  0xfc   : > { %v1022_v40 = vpack.c.bf16 %v990_v36, %v990_v36  ;;  %v820_v41 = vadd.f32 %v756_v37, %v302_v34  ;;  %1070 = vst.msk [vmem:[%s1679_s29 + $0x5c] sm:$0xf] %vm1046_vm4, %v1037_v38  ;;  %v902_v42 = vld [vmem:[#allocation2 + $0xc0] sm:$0xff] }
  0xfd   : > { %v938_v43 = vmul.f32 %v1663_v62, %v902_v42  ;;  %868 = vst.msk [vmem:[#allocation2 + $0xc8] sm:$0xff] %vm259_vm3, %v835_v39 }
  0xfe   : > { %1055 = vst.msk [vmem:[%s1679_s29 + $0x20] sm:$0xf] %vm1046_vm4, %v1022_v40  ;;  %v887_v47 = vld [vmem:[#allocation2 + $0x48] sm:$0xff]  ;;  %v802_v40 = vpop.f32.mrf.mxu3 }
  0xff   : > { %v762_v45 = vpop.f32.mrf.mxu1  ;;  %v974_v46 = vadd.f32 %v1668_v0, %v938_v43  ;;  %v923_v48 = vmul.f32 %v1663_v62, %v887_v47  ;;  %853 = vst.msk [vmem:[#allocation2 + $0x50] sm:$0xff] %vm259_vm3, %v820_v41  ;;  %v706_v49 = vpop.f32.mrf.mxu2 }
 0x100   : > { %v796_v51 = vadd.f32 %v795_v28, %v706_v49 }
 0x101   : > { %v668_v53 = vpop.f32.mrf.mxu0  ;;  %v1006_v54 = vmax.f32 %v974_v46, 0.0  ;;  %v959_v55 = vadd.f32 %v1668_v0, %v923_v48  ;;  %v308_v48 = vld [vmem:[#allocation2 + $0x80] sm:$0xff] }
 0x102   : > { %v758_v56 = vadd.f32 %v757_v5, %v668_v53  ;;  %v836_v57 = vadd.f32 %v796_v51, %v318_v44  ;;  %v321_v51 = vld [vmem:[#allocation2 + $0xe8] sm:$0xff] }
 0x103   : > { %v1038_v59 = vpack.c.bf16 %v1006_v54, %v1006_v54  ;;  %v991_v60 = vmax.f32 %v959_v55, 0.0 }
 0x104   : > { %v821_v61 = vadd.f32 %v758_v56, %v303_v52  ;;  %869 = vst.msk [vmem:[#allocation2 + $0xd0] sm:$0xff] %vm259_vm3, %v836_v57  ;;  %v903_v1 = vld [vmem:[#allocation2 + $0xc8] sm:$0xff]  ;;  %v306_v56 = vld [vmem:[#allocation2 + $0x70] sm:$0xff] }
 0x105   : > { %1071 = vst.msk [vmem:[%s1679_s29 + $0x60] sm:$0xf] %vm1046_vm4, %v1038_v59  ;;  %v1023_v63 = vpack.c.bf16 %v991_v60, %v991_v60  ;;  %v939_v3 = vmul.f32 %v1663_v62, %v903_v1 }
 0x106   : > { %v888_v4 = vld [vmem:[#allocation2 + $0x50] sm:$0xff]  ;;  %854 = vst.msk [vmem:[#allocation2 + $0x58] sm:$0xff] %vm259_vm3, %v821_v61 }
 0x107   : > { %v1766_v2 = vpop.f32.mrf.mxu1  ;;  %1056 = vst.msk [vmem:[%s1679_s29 + $0x24] sm:$0xf] %vm1046_vm4, %v1023_v63  ;;  %v924_v5 = vmul.f32 %v1663_v62, %v888_v4  ;;  %v708_v8 = vpop.f32.mrf.mxu2  ;;  %v975_v9 = vadd.f32 %v1668_v0, %v939_v3 }
 0x108   : > { %v798_v10 = vadd.f32 %v797_v50, %v708_v8 }
 0x109   : > { %v671_v12 = vpop.f32.mrf.mxu0  ;;  %v960_v13 = vadd.f32 %v1668_v0, %v924_v5  ;;  %v1007_v16 = vmax.f32 %v975_v9, 0.0  ;;  %v805_v5 = vpop.f32.mrf.mxu3 }
 0x10a   : > { %v761_v15 = vadd.f32 %v760_v27, %v671_v12  ;;  %v837_v17 = vadd.f32 %v798_v10, %v319_v7  ;;  %v309_v7 = vld [vmem:[#allocation2 + $0x88] sm:$0xff]  ;;  %v322_v12 = vld [vmem:[#allocation2 + $0xf0] sm:$0xff] }
 0x10b   : > { %v992_v18 = vmax.f32 %v960_v13, 0.0  ;;  %v904_v19 = vld [vmem:[#allocation2 + $0xd0] sm:$0xff]  ;;  %v1039_v21 = vpack.c.bf16 %v1007_v16, %v1007_v16  ;;  %v307_v16 = vld [vmem:[#allocation2 + $0x78] sm:$0xff] }
 0x10c   : > { %v822_v20 = vadd.f32 %v761_v15, %v304_v11  ;;  %v940_v22 = vmul.f32 %v1663_v62, %v904_v19  ;;  %870 = vst.msk [vmem:[#allocation2 + $0xd8] sm:$0xff] %vm259_vm3, %v837_v17 }
 0x10d   : > { %v1024_v23 = vpack.c.bf16 %v992_v18, %v992_v18  ;;  %v889_v24 = vld [vmem:[#allocation2 + $0x58] sm:$0xff]  ;;  %1072 = vst.msk [vmem:[%s1679_s29 + $0x64] sm:$0xf] %vm1046_vm4, %v1039_v21 }
 0x10e   : > { %855 = vst.msk [vmem:[#allocation2 + $0x60] sm:$0xff] %vm259_vm3, %v822_v20  ;;  %v976_v27 = vadd.f32 %v1668_v0, %v940_v22  ;;  %v925_v28 = vmul.f32 %v1663_v62, %v889_v24 }
 0x10f   : > { %v1778_v26 = vpop.f32.mrf.mxu1  ;;  %1057 = vst.msk [vmem:[%s1679_s29 + $0x28] sm:$0xf] %vm1046_vm4, %v1024_v23  ;;  %v711_v29 = vpop.f32.mrf.mxu2 }
 0x110   : > { %v1008_v30 = vmax.f32 %v976_v27, 0.0  ;;  %v961_v31 = vadd.f32 %v1668_v0, %v925_v28  ;;  %v801_v32 = vadd.f32 %v800_v14, %v711_v29 }
 0x111   : > { %v673_v34 = vpop.f32.mrf.mxu0 }
 0x112   : > { %v763_v35 = vadd.f32 %v762_v45, %v673_v34  ;;  %v1040_v36 = vpack.c.bf16 %v1008_v30, %v1008_v30  ;;  %v993_v37 = vmax.f32 %v961_v31, 0.0  ;;  %v838_v38 = vadd.f32 %v801_v32, %v320_v25  ;;  %v323_v34 = vld [vmem:[#allocation2 + $0xf8] sm:$0xff] }
 0x113   : > { %v905_v39 = vld [vmem:[#allocation2 + $0xd8] sm:$0xff] }
 0x114   : > { %v823_v41 = vadd.f32 %v763_v35, %v305_v33  ;;  %1073 = vst.msk [vmem:[%s1679_s29 + $0x68] sm:$0xf] %vm1046_vm4, %v1040_v36  ;;  %v1025_v42 = vpack.c.bf16 %v993_v37, %v993_v37  ;;  %v941_v43 = vmul.f32 %v1663_v62, %v905_v39  ;;  %v807_v33 = vpop.f32.mrf.mxu3 }
 0x115   : > { %v890_v47 = vld [vmem:[#allocation2 + $0x60] sm:$0xff]  ;;  %871 = vst.msk [vmem:[#allocation2 + $0xe0] sm:$0xff] %vm259_vm3, %v838_v38 }
 0x116   : > { %v926_v46 = vmul.f32 %v1663_v62, %v890_v47  ;;  %1058 = vst.msk [vmem:[%s1679_s29 + $0x2c] sm:$0xf] %vm1046_vm4, %v1025_v42  ;;  %v977_v45 = vadd.f32 %v1668_v0, %v941_v43 }
 0x117   : > { %v770_v44 = vpop.f32.mrf.mxu1  ;;  %856 = vst.msk [vmem:[#allocation2 + $0x68] sm:$0xff] %vm259_vm3, %v823_v41  ;;  %v713_v52 = vpop.f32.mrf.mxu2 }
 0x118   : > { %v771_v49 = vadd.f32 %v770_v44, %v1658_v58  ;;  %v962_v50 = vadd.f32 %v1668_v0, %v926_v46  ;;  %v1009_v53 = vmax.f32 %v977_v45, 0.0  ;;  %v803_v55 = vadd.f32 %v802_v40, %v713_v52 }
 0x119   : > { %v676_v57 = vpop.f32.mrf.mxu0 }
 0x11a   : > { %v826_v54 = vadd.f32 %v771_v49, %v308_v48  ;;  %v994_v59 = vmax.f32 %v962_v50, 0.0  ;;  %v766_v60 = vadd.f32 %v1766_v2, %v676_v57  ;;  %v1041_v61 = vpack.c.bf16 %v1009_v53, %v1009_v53 }
 0x11b   : > { %v839_v58 = vadd.f32 %v803_v55, %v321_v51 }
 0x11c   : > { %859 = vst.msk [vmem:[#allocation2 + $0x80] sm:$0xff] %vm259_vm3, %v826_v54  ;;  %v1026_v63 = vpack.c.bf16 %v994_v59, %v994_v59  ;;  %v824_v1 = vadd.f32 %v766_v60, %v306_v56  ;;  %v906_v3 = vld [vmem:[#allocation2 + $0xe0] sm:$0xff] }
 0x11d   : > { %1074 = vst.msk [vmem:[%s1679_s29 + $0x6c] sm:$0xf] %vm1046_vm4, %v1041_v61  ;;  %v942_v4 = vmul.f32 %v1663_v62, %v906_v3 }
 0x11e   : > { %1059 = vst.msk [vmem:[%s1679_s29 + $0x30] sm:$0xf] %vm1046_vm4, %v1026_v63  ;;  %v891_v9 = vld [vmem:[#allocation2 + $0x68] sm:$0xff] }
 0x11f   : > { %v772_v8 = vpop.f32.mrf.mxu1  ;;  %872 = vst.msk [vmem:[#allocation2 + $0xe8] sm:$0xff] %vm259_vm3, %v839_v58  ;;  %v978_v10 = vadd.f32 %v1668_v0, %v942_v4  ;;  %v927_v11 = vmul.f32 %v1663_v62, %v891_v9  ;;  %v716_v13 = vpop.f32.mrf.mxu2 }
 0x120   : > { %v773_v2 = vadd.f32 %v772_v8, %v1674_v6  ;;  %857 = vst.msk [vmem:[#allocation2 + $0x70] sm:$0xff] %vm259_vm3, %v824_v1  ;;  %v806_v15 = vadd.f32 %v805_v5, %v716_v13 }
 0x121   : > { %v678_v17 = vpop.f32.mrf.mxu0  ;;  %v1010_v18 = vmax.f32 %v978_v10, 0.0  ;;  %v963_v19 = vadd.f32 %v1668_v0, %v927_v11 }
 0x122   : > { %v827_v14 = vadd.f32 %v773_v2, %v309_v7  ;;  %v768_v21 = vadd.f32 %v1778_v26, %v678_v17  ;;  %v840_v22 = vadd.f32 %v806_v15, %v322_v12 }
 0x123   : > { %v894_v20 = vld [vmem:[#allocation2 + $0x80] sm:$0xff]  ;;  %v1042_v23 = vpack.c.bf16 %v1010_v18, %v1010_v18  ;;  %v995_v24 = vmax.f32 %v963_v19, 0.0 }
 0x124   : > { %v930_v6 = vmul.f32 %v1663_v62, %v894_v20  ;;  %860 = vst.msk [vmem:[#allocation2 + $0x88] sm:$0xff] %vm259_vm3, %v827_v14  ;;  %v825_v27 = vadd.f32 %v768_v21, %v307_v16 }
 0x125   : > { %873 = vst.msk [vmem:[#allocation2 + $0xf0] sm:$0xff] %vm259_vm3, %v840_v22  ;;  %v1027_v25 = vpack.c.bf16 %v995_v24, %v995_v24 }
 0x126   : > { %v966_v28 = vadd.f32 %v1668_v0, %v930_v6  ;;  %1075 = vst.msk [vmem:[%s1679_s29 + $0x70] sm:$0xf] %vm1046_vm4, %v1042_v23  ;;  %v907_v29 = vld [vmem:[#allocation2 + $0xe8] sm:$0xff] }
 0x127   : > { %v943_v26 = vmul.f32 %v1663_v62, %v907_v29  ;;  %v892_v31 = vld [vmem:[#allocation2 + $0x70] sm:$0xff]  ;;  %858 = vst.msk [vmem:[#allocation2 + $0x78] sm:$0xff] %vm259_vm3, %v825_v27  ;;  %v718_v35 = vpop.f32.mrf.mxu2 }
 0x128   : > { %v998_v30 = vmax.f32 %v966_v28, 0.0  ;;  %1060 = vst.msk [vmem:[%s1679_s29 + $0x34] sm:$0xf] %vm1046_vm4, %v1027_v25  ;;  %v928_v32 = vmul.f32 %v1663_v62, %v892_v31  ;;  %v808_v38 = vadd.f32 %v807_v33, %v718_v35 }
 0x129   : > { %v979_v37 = vadd.f32 %v1668_v0, %v943_v26 }
 0x12a   : > { %v1030_v36 = vpack.c.bf16 %v998_v30, %v998_v30  ;;  %v964_v39 = vadd.f32 %v1668_v0, %v928_v32  ;;  %v841_v43 = vadd.f32 %v808_v38, %v323_v34 }
 0x12b   : > { %v895_v40 = vld [vmem:[#allocation2 + $0x88] sm:$0xff]  ;;  %v1011_v41 = vmax.f32 %v979_v37, 0.0 }
 0x12c   : > { %1063 = vst.msk [vmem:[%s1679_s29 + $0x40] sm:$0xf] %vm1046_vm4, %v1030_v36  ;;  %v931_v42 = vmul.f32 %v1663_v62, %v895_v40  ;;  %v996_v47 = vmax.f32 %v964_v39, 0.0  ;;  %v908_v46 = vld [vmem:[#allocation2 + $0xf0] sm:$0xff] }
 0x12d   : > { %v1043_v48 = vpack.c.bf16 %v1011_v41, %v1011_v41  ;;  %v944_v45 = vmul.f32 %v1663_v62, %v908_v46  ;;  %874 = vst.msk [vmem:[#allocation2 + $0xf8] sm:$0xff] %vm259_vm3, %v841_v43 }
 0x12e   : > { %v967_v44 = vadd.f32 %v1668_v0, %v931_v42  ;;  %v1028_v49 = vpack.c.bf16 %v996_v47, %v996_v47  ;;  %v893_v50 = vld [vmem:[#allocation2 + $0x78] sm:$0xff] }
 0x12f   : > { %1076 = vst.msk [vmem:[%s1679_s29 + $0x74] sm:$0xf] %vm1046_vm4, %v1043_v48  ;;  %v980_v52 = vadd.f32 %v1668_v0, %v944_v45  ;;  %v929_v53 = vmul.f32 %v1663_v62, %v893_v50 }
 0x130   : > { %v999_v51 = vmax.f32 %v967_v44, 0.0  ;;  %1061 = vst.msk [vmem:[%s1679_s29 + $0x38] sm:$0xf] %vm1046_vm4, %v1028_v49 }
 0x131   : > { %v1012_v55 = vmax.f32 %v980_v52, 0.0  ;;  %v965_v56 = vadd.f32 %v1668_v0, %v929_v53 }
 0x132   : > { %v1031_v54 = vpack.c.bf16 %v999_v51, %v999_v51 }
 0x133   : > { %v1044_v57 = vpack.c.bf16 %v1012_v55, %v1012_v55  ;;  %v997_v59 = vmax.f32 %v965_v56, 0.0 }
 0x134   : > { %1064 = vst.msk [vmem:[%s1679_s29 + $0x44] sm:$0xf] %vm1046_vm4, %v1031_v54  ;;  %v909_v60 = vld [vmem:[#allocation2 + $0xf8] sm:$0xff] }
 0x135   : > { %1077 = vst.msk [vmem:[%s1679_s29 + $0x78] sm:$0xf] %vm1046_vm4, %v1044_v57  ;;  %v1029_v61 = vpack.c.bf16 %v997_v59, %v997_v59  ;;  %v945_v58 = vmul.f32 %v1663_v62, %v909_v60 }
 0x137   : > { %1062 = vst.msk [vmem:[%s1679_s29 + $0x3c] sm:$0xf] %vm1046_vm4, %v1029_v61  ;;  %v981_v63 = vadd.f32 %v1668_v0, %v945_v58 }
 0x139   : > { %v1013_v1 = vmax.f32 %v981_v63, 0.0 }
 0x13b   : > { %v1045_v3 = vpack.c.bf16 %v1013_v1, %v1013_v1 }
 0x13d   : > { %1078 = vst.msk [vmem:[%s1679_s29 + $0x7c] sm:$0xf] %vm1046_vm4, %v1045_v3 }
 0x13e PF: > { %s14_s17 = sadd.s32 1, %s1460_s17   ;;  %s1862_s15 = smov %s1456_s16 }
 0x13f   : > { %p11_p5 = scmp.ge.s32.totalorder %s14_s17, 4   ;;  %s1863_s16 = smov %s1865_s18 }
 0x141   :  { %13 = sbr.rel (!%p11_p5) target bundleno = 2 (0x2), region = 77 }

</bundles_post_ra>
